<compile_context>
chip_gen: v7x
topology: tpu7x:2x2x1
jax: 0.10.0
libtpu: 0.0.40
codegen_flags: <defaults>
</compile_context>

<pallas_src>
import jax
import jax.numpy as jnp
from jax.experimental import pallas as pl
from jax.experimental.pallas import tpu as pltpu


def _weighted_mse_kernel(out_ref, tgt_ref, w2_ref, acc_ref):
    # acc_ref: (8, 128) f32 output block for this parallel chunk, revisited
    # across the inner ("arbitrary") reduction axis.
    @pl.when(pl.program_id(1) == 0)
    def _():
        acc_ref[...] = jnp.zeros_like(acc_ref)

    o = out_ref[...].astype(jnp.float32)
    t = tgt_ref[...].astype(jnp.float32)
    diff = o - t
    # (scaled + target) - target cancels, so err^2 = (diff * w)^2 = diff^2 * w^2.
    sq = diff * diff * w2_ref[...]            # (TR, 128) * (TR, 1) lane-broadcast
    # Sublane-reduce to (1, 128) lane partials; single-vreg RMW per step.
    acc_ref[0:1, :] += jnp.sum(sq, axis=0, keepdims=True)


def weighted_mse_loss(output, target, weights, *, max_tile_rows=4096):
    """output/target: (B, C, H, W); weights: scalar or (C,) per-channel."""
    assert output.shape == target.shape
    B, C, H, W = output.shape
    n_elems = B * C * H * W

    # TODO(synk): lane-pad H*W when it is not a multiple of 128 (general shapes).
    assert (H * W) % 128 == 0, "H*W must be a multiple of 128 lanes"

    R = n_elems // 128                  # rows of the flattened (R, 128) slab
    rows_per_chan = (H * W) // 128      # each 128-lane row lies in one channel

    weights = jnp.asarray(weights, jnp.float32)
    if weights.ndim == 0:
        weights = jnp.full((C,), weights, jnp.float32)
    assert weights.shape == (C,)

    # Tiny per-row weight^2 column replaces the full-size broadcast tensor.
    w2_rows = jnp.tile(jnp.repeat(weights * weights, rows_per_chan), B)
    w2_rows = w2_rows.reshape(R, 1)

    out2d = output.reshape(R, 128)
    tgt2d = target.reshape(R, 128)

    # Two parallel chunks (v7x dual-TensorCore); cheap outer loop on v5e/v6e.
    P = 2 if R >= 16 else 1
    tile_rows = min(max_tile_rows, pl.cdiv(R, P))
    tile_rows = max(8, ((tile_rows + 7) // 8) * 8)      # sublane-aligned blocks
    k_inner = pl.cdiv(R, P * tile_rows)                 # reduction steps / chunk
    r_pad = P * k_inner * tile_rows

    if r_pad != R:                                      # zero rows contribute 0
        pad = r_pad - R
        out2d = jnp.pad(out2d, ((0, pad), (0, 0)))
        tgt2d = jnp.pad(tgt2d, ((0, pad), (0, 0)))
        w2_rows = jnp.pad(w2_rows, ((0, pad), (0, 0)))

    data_spec = pl.BlockSpec((tile_rows, 128), lambda p, k: (p * k_inner + k, 0))
    w_spec = pl.BlockSpec((tile_rows, 1), lambda p, k: (p * k_inner + k, 0))
    out_spec = pl.BlockSpec((8, 128), lambda p, k: (p, 0))

    partials = pl.pallas_call(
        _weighted_mse_kernel,
        out_shape=jax.ShapeDtypeStruct((P * 8, 128), jnp.float32),
        grid_spec=pltpu.PrefetchScalarGridSpec(
            num_scalar_prefetch=0,
            grid=(P, k_inner),
            in_specs=[data_spec, data_spec, w_spec],
            out_specs=out_spec,
        ),
        compiler_params=pltpu.CompilerParams(
            dimension_semantics=("parallel", "arbitrary"),
            vmem_limit_bytes=32 * 1024 * 1024,
        ),
    )(out2d, tgt2d, w2_rows)

    # MSE mean reduction (tiny: P*8*128 partials).
    return jnp.sum(partials) / jnp.float32(n_elems)


if __name__ == "__main__":
    key = jax.random.PRNGKey(0)
    k1, k2 = jax.random.split(key)

    B, C, H, W = 2, 4, 16, 16
    output = jax.random.normal(k1, (B, C, H, W), dtype=jnp.float32)
    target = jax.random.normal(k2, (B, C, H, W), dtype=jnp.float32)

    # Deterministic per-channel loss weights (module __init__ arg).
    weights = jnp.linspace(0.5, 2.0, C, dtype=jnp.float32)

    loss = weighted_mse_loss(output, target, weights)
    loss = jax.block_until_ready(loss)

    # Pure-JAX reference of the original module semantics.
    w_full = jnp.broadcast_to(weights.reshape(1, C, 1, 1), output.shape)
    diff = output - target
    w_out = diff * w_full + target
    ref = jnp.mean((w_out - target) ** 2)
    assert jnp.allclose(loss, ref, rtol=1e-5, atol=1e-6), (loss, ref)

    print("KERNEL_OK")
</pallas_src>

<mosaic_0001>
module attributes {stable_mosaic.version = 11 : i64} {
  func.func @_weighted_mse_kernel(%arg0: i32, %arg1: i32, %arg2: memref<8x128xf32, #tpu.memory_space<vmem>>, %arg3: memref<8x128xf32, #tpu.memory_space<vmem>>, %arg4: memref<8x1xf32, #tpu.memory_space<vmem>>, %arg5: memref<8x128xf32, #tpu.memory_space<vmem>>) attributes {dimension_semantics = [#tpu.dimension_semantics<parallel>, #tpu.dimension_semantics<arbitrary>], iteration_bounds = array<i64: 2, 1>, scalar_prefetch = 0 : i64, scratch_operands = 0 : i64, tpu.core_type = #tpu.core_type<tc>, window_params = [{transform_indices = @transform_0, window_bounds = array<i64: 8, 128>}, {transform_indices = @transform_1, window_bounds = array<i64: 8, 128>}, {transform_indices = @transform_2, window_bounds = array<i64: 8, 1>}, {transform_indices = @transform_3, window_bounds = array<i64: 8, 128>}]} {
    %c0_i32 = arith.constant 0 : i32
    %0 = arith.cmpi eq, %arg1, %c0_i32 : i32
    %1 = arith.extui %0 : i1 to i32
    %c0_i32_0 = arith.constant 0 : i32
    %2 = arith.cmpi ne, %1, %c0_i32_0 : i32
    scf.if %2 {
      %cst_10 = arith.constant 0.000000e+00 : f32
      %15 = vector.broadcast %cst_10 : f32 to vector<8x128xf32>
      %c0_11 = arith.constant 0 : index
      %c0_12 = arith.constant 0 : index
      %16 = vector.load %arg5[%c0_11, %c0_12] : memref<8x128xf32, #tpu.memory_space<vmem>>, vector<8x128xf32>
      tpu.vector_store %arg5[%c0_11, %c0_12], %15 {strides = array<i32>} : memref<8x128xf32, #tpu.memory_space<vmem>>, vector<8x128xf32>,
    } else {
    }
    %c0 = arith.constant 0 : index
    %c0_1 = arith.constant 0 : index
    %3 = vector.load %arg2[%c0, %c0_1] : memref<8x128xf32, #tpu.memory_space<vmem>>, vector<8x128xf32>
    %c0_2 = arith.constant 0 : index
    %c0_3 = arith.constant 0 : index
    %4 = vector.load %arg3[%c0_2, %c0_3] : memref<8x128xf32, #tpu.memory_space<vmem>>, vector<8x128xf32>
    %5 = arith.subf %3, %4 : vector<8x128xf32>
    %6 = arith.mulf %5, %5 : vector<8x128xf32>
    %c0_4 = arith.constant 0 : index
    %c0_5 = arith.constant 0 : index
    %7 = vector.load %arg4[%c0_4, %c0_5] : memref<8x1xf32, #tpu.memory_space<vmem>>, vector<8x1xf32>
    %8 = vector.broadcast %7 : vector<8x1xf32> to vector<8x128xf32>
    %9 = arith.mulf %6, %8 : vector<8x128xf32>
    %c0_6 = arith.constant 0 : index
    %c0_7 = arith.constant 0 : index
    %10 = vector.load %arg5[%c0_6, %c0_7] : memref<8x128xf32, #tpu.memory_space<vmem>>, vector<1x128xf32>
    %cst = arith.constant dense<0.000000e+00> : vector<128xf32>
    %11 = vector.multi_reduction <add>, %9, %cst [0] : vector<8x128xf32> to vector<128xf32>
    %12 = vector.shape_cast %11 : vector<128xf32> to vector<1x128xf32>
    %13 = arith.addf %10, %12 : vector<1x128xf32>
    %c0_8 = arith.constant 0 : index
    %c0_9 = arith.constant 0 : index
    %14 = vector.load %arg5[%c0_8, %c0_9] : memref<8x128xf32, #tpu.memory_space<vmem>>, vector<1x128xf32>
    tpu.vector_store %arg5[%c0_8, %c0_9], %13 {strides = array<i32>} : memref<8x128xf32, #tpu.memory_space<vmem>>, vector<1x128xf32>,
    return
  }
  func.func @transform_0(%arg0: i32, %arg1: i32) -> (i32, i32) {
    %c1_i32 = arith.constant 1 : i32
    %0 = arith.muli %arg0, %c1_i32 : i32
    %1 = arith.addi %0, %arg1 : i32
    %c0_i32 = arith.constant 0 : i32
    %c0_i32_0 = arith.constant 0 : i32
    return %1, %c0_i32 : i32, i32
  }
  func.func @transform_1(%arg0: i32, %arg1: i32) -> (i32, i32) {
    %c1_i32 = arith.constant 1 : i32
    %0 = arith.muli %arg0, %c1_i32 : i32
    %1 = arith.addi %0, %arg1 : i32
    %c0_i32 = arith.constant 0 : i32
    %c0_i32_0 = arith.constant 0 : i32
    return %1, %c0_i32 : i32, i32
  }
  func.func @transform_2(%arg0: i32, %arg1: i32) -> (i32, i32) {
    %c1_i32 = arith.constant 1 : i32
    %0 = arith.muli %arg0, %c1_i32 : i32
    %1 = arith.addi %0, %arg1 : i32
    %c0_i32 = arith.constant 0 : i32
    %c0_i32_0 = arith.constant 0 : i32
    return %1, %c0_i32 : i32, i32
  }
  func.func @transform_3(%arg0: i32, %arg1: i32) -> (i32, i32) {
    %c0_i32 = arith.constant 0 : i32
    %c0_i32_0 = arith.constant 0 : i32
    return %arg0, %c0_i32 : i32, i32
  }
}

</mosaic_0001>

<bundles_post_ra>
// kernel: tpu_custom_call.1
= control target key start
LH: loop header
LB: loop body
LE: loop exit
PB: predicated region body
PF: predicated region fallthrough
CT: control target
= control target key end

     0   :  { %8 = vsyncpa [#allocation3], 0  ;;  %s790_s0 = inlined_call_operand.vmem [shape: f32[16,128], index: 0, kind: input, shape index: {}]   ;;  %s791_s1 = inlined_call_operand.hbm [shape: f32[16,128], index: 1, kind: input, shape index: {}]   ;;  %s792_s2 = inlined_call_operand.vmem [shape: f32[16,1], index: 2, kind: input, shape index: {}]   ;;  %s793_s3 = inlined_call_operand.hbm [shape: f32[16,128], index: 3, kind: output, shape index: {}]  }
   0x1   :  { %10 = vsyncpa [#allocation3 + $0x1], 0 }
   0x2   :  { %11 = vsyncpa [#allocation4], 0 }
   0x3   :  { %13 = vsyncpa [#allocation4 + $0x1], 0  ;;  %s610_s12 = smov 0   ;;  %s612_s13 = smov 0  }
   0x4   :  { %s614_s14 = smov 0   ;;  %s616_s15 = smov 0  }
   0x5   :  { %s618_s16 = smov 0   ;;  %s620_s17 = smov 0  }
   0x6 LB: > { %s392_s18 = sadd.s32 4294967295, %s584_s17   ;;  %s393_s19 = sadd.s32 4294967294, %s584_s17   ;;  %s584_s17 = sphi %s620_s17, %s19_s17   ;;  %s580_s16 = sphi %s618_s16, %s809_s16   ;;  %s576_s15 = sphi %s616_s15, %s808_s15   ;;  %s572_s14 = sphi %s614_s14, %s807_s14   ;;  %s568_s13 = sphi %s612_s13, %s806_s13   ;;  %s564_s12 = sphi %s610_s12, %s805_s12  }
   0x7   : > { %s31_s20 = sadd.s32 1, %s580_s16  ;;  %s68_s21 = sadd.s32 1, %s572_s14 }
   0x8   : > { %p33_p0 = scmp.ge.s32.totalorder %s31_s20, 2  ;;  %p75_p1 = scmp.ne.s32.totalorder %s572_s14, %s568_s13 }
   0x9   : > { %p76_p2 = scmp.eq.s32.totalorder %s584_s17, 0  ;;  %p81_p3 = scmp.ne.s32.totalorder %s568_s13, %s564_s12 }
   0xa   : > { %s811_s20 = smov (%p33_p0, %s31_s20), 0  ;;  %p82_p5 = scmp.eq.s32.totalorder %s392_s18, 0 }
   0xb   : > { %p651_p4 = por %p76_p2, %p75_p1  ;;  %s65_s23 = ssub.s32 %s580_s16, %s811_s20 }
   0xc   : > { %p133_p6 = scmp.eq.s32.totalorder %s392_s18, 1  ;;  %p66_p7 = scmp.eq.s32.totalorder %s65_s23, 0 }
   0xd   : > { %p657_p8 = por %p82_p5, %p81_p3  ;;  %p139_p10 = scmp.eq.s32.totalorder %s393_s19, 1 }
   0xe   : > { %p661_p9 = por %p133_p6, %p75_p1  ;;  %p419_p13 = scmp.lt.s32.totalorder %s584_s17, 2 }
   0xf   : > { %s666_s26 = scalar_select %p66_p7, %s572_s14, %s68_s21  }
  0x10   : > { %s797_s25 = scalar_select %p661_p9, 1, 0 }
  0x11   : > { %p668_p11 = por %p139_p10, %p81_p3  ;;  %s168_s28 = sand.u32 1, %s572_s14  }
  0x12   : > { %s396_s29 = sshll.u32 %s168_s28, 3  ;;  %s397_s30 = sshll.u32 %s580_s16, 7 }
  0x13   : > { %s798_s27 = scalar_select %p668_p11, 1, 0 }
  0x14   : > { %s679_s6 = scalar_lea.hbm %s791_s1, %s397_s30  ;;  %s172_s7 = scalar_lea.vmem [#allocation2], %s396_s29 }
  0x15   : > { %s180_s8 = sshll.u32 %s172_s7, 4  ;;  %p685_p0 = pnand %p419_p13, %p651_p4  ;;  %s681_s8 = int_to_ptr.vmem [resolvable:$true] %s180_s8 }
  0x16   : > { %s169_s10 = scalar_lea.sflag [#allocation3], %s168_s28  ;;  %s472_s11 = scalar_lea.hbm %s679_s6, 128 }
  0x17   : > { %p473_p3 = scmp.ne.s32.totalorder %s679_s6, %s472_s11  ;;  %p474_p5 = pneg %p685_p0 }
  0x18   : > { %s477_s21 = scalar_lea.hbm %s791_s1, 256  ;;  %p478_p4 = scmp.lt.u32.totalorder %s679_s6, %s791_s1 }
  0x19   : > { %p475_p6 = pnand %p474_p5, %p473_p3  ;;  %p479_p10 = scmp.lt.u32.totalorder %s477_s21, %s472_s11 }
  0x1a   : > { %p481_p12 = scmp.lt.u32.totalorder %s472_s11, %s679_s6 }
  0x1b   : > { %p476_p7 = pneg %p475_p6  ;;  %p480_p13 = por %p479_p10, %p478_p4 }
  0x1d   : > { %p482_p1 = por %p481_p12, %p480_p13 }
  0x1f   : > { %p483_p2 = pnand %p482_p1, %p476_p7 }
  0x21   : > { %486 = shalt.err (!%p483_p2)
}
  0x22   : > { %s487_s28 = scalar_lea.vmem %s681_s8, 128  ;;  %s586_s29 = smov [#allocation2]  }
  0x23   : > { %p488_p3 = scmp.ne.s32.totalorder %s681_s8, %s487_s28  ;;  %s492_s30 = sshll.u32 %s586_s29, 4  ;;  %s493_s30 = int_to_ptr.vmem [resolvable:$false] %s492_s30 }
  0x24   : > { %s494_s4 = scalar_lea.vmem %s493_s30, 256  ;;  %p495_p9 = scmp.lt.s32.totalorder %s681_s8, %s493_s30 }
  0x25   : > { %p490_p6 = pnand %p488_p3, %p474_p5  ;;  %p496_p4 = scmp.lt.s32.totalorder %s494_s4, %s487_s28 }
  0x27   : > { %p491_p11 = pneg %p490_p6  ;;  %p497_p10 = por %p496_p4, %p495_p9 }
  0x29   : > { %p498_p12 = pnand %p497_p10, %p491_p11 }
  0x2b   : > { %501 = shalt.err (!%p498_p12)
}
  0x2c   : > { %414 = dma.hbm_to_vmem [thread:$0]  (!%p685_p0), %s679_s6, 128, %s681_s8, %s169_s10  }
  0x2d   : > { %p800_p1 = scmp.lt.s32.totalorder %s584_s17, 3  ;;  %p801_p2 = scmp.ge.s32.totalorder %s584_s17, 1 }
  0x2f   : > { %p195_p5 = pnand %p801_p2, %p800_p1 }
  0x30   : > { %s721_s5 = sand.u32 (!%p195_p5), 1, %s568_s13  }
  0x31   : > { %198 = sbr.rel (%p195_p5) target bundleno = 222 (0xde), region = 32  ;;  %s399_s7 = sshll.u32 (!%p195_p5), %s721_s5, 3 }
  0x32   : > { %s201_s11 = scalar_lea.sflag (!%p195_p5), [#allocation3], %s721_s5  ;;  %s204_s18 = scalar_lea.vmem (!%p195_p5), [#allocation2], %s399_s7 }
  0x38   : > { %555 = dma.done.wait (%p657_p8), %s201_s11, 128  }
  0x39   : > { %557 = vsyncadd (%p657_p8), %s201_s11, 4294967168  ;;  %p238_p9 = scmp.lt.s32.totalorder %s576_s15, 1  ;;  %s236_s6 = scalar_lea.vmem [#allocation5], %s399_s7  ;;  %v587_v0 = vmov 0.0   ;;  %v588_v1 = vmov 0   ;;  %v256_v4 = vld [vmem:[%s204_s18] sm:$0xff] }
  0x3a   : > { %254 = vst [vmem:[%s236_s6] sm:$0xff] %v587_v0  ;;  %471 = vset.pattern.permute.xlu0 %v588_v1  ;;  %s404_s28 = sshll.u32 %s576_s15, 7  ;;  %s289_s29 = sshll.u32 %s236_s6, 4  ;;  %s743_s29 = int_to_ptr.vmem [resolvable:$true] %s289_s29 }
  0x3b   : > { %s239_s8 = scalar_select %p238_p9, %s576_s15, 1 }
  0x3c   : > { %s741_s7 = scalar_lea.hbm %s793_s3, %s404_s28  ;;  %s276_s11 = scalar_lea.sflag [#allocation4], %s721_s5 }
  0x3d   : > { %s401_s9 = sshll.u32 %s239_s8, 3  ;;  %s502_s18 = scalar_lea.vmem %s743_s29, 128 }
  0x3e   : > { %s248_s21 = scalar_lea.vmem %s792_s2, %s401_s9  ;;  %s241_s23 = scalar_lea.vmem %s790_s0, %s401_s9 }
  0x3f   : > { %v259_v2 = vld [vmem:[%s248_s21] sm:$0xff]  ;;  %p503_p8 = scmp.ne.s32.totalorder %s743_s29, %s502_s18  ;;  %p802_p11 = scmp.ne.s32.totalorder %s797_s25, 0 }
  0x40   : > { %262 = vperm.xlu0 %471, %v259_v2   ;;  %v255_v3 = vld [vmem:[%s241_s23] sm:$0xff]  ;;  %s589_s15 = smov [#allocation5]  }
  0x41   : > { %v257_v5 = vsub.f32 %v255_v3, %v256_v4  ;;  %v266_v14 = vld [vmem:[%s236_s6] sm:$0x1]  ;;  %p504_p0 = pnand %p503_p8, %p802_p11  ;;  %s506_s8 = sshll.u32 %s589_s15, 4  ;;  %s507_s8 = int_to_ptr.vmem [resolvable:$false] %s506_s8 }
  0x42   : > { %s508_s9 = scalar_lea.vmem %s507_s8, 256  ;;  %p509_p13 = scmp.lt.s32.totalorder %s743_s29, %s507_s8 }
  0x43   : > { %v258_v6 = vmul.f32 %v257_v5, %v257_v5  ;;  %p505_p7 = pneg %p504_p0  ;;  %p510_p3 = scmp.lt.s32.totalorder %s508_s9, %s502_s18 }
  0x45   : > { %p511_p6 = por %p510_p3, %p509_p13 }
  0x47   : > { %p512_p4 = pnand %p511_p6, %p505_p7 }
  0xbf   : > { %v263_v7 = vpop.permute.xlu0 %262 }
  0xc0   : > { %v265_v8 = vmul.f32 %v263_v7, %v258_v6 }
  0xc2   : > { %v267_v9 = vrot.slane %v265_v8, 4 }
  0xc4   : > { %v268_v10 = vadd.f32 %v267_v9, %v265_v8 }
  0xc6   : > { %v269_v11 = vrot.slane %v268_v10, 2 }
  0xc8   : > { %v270_v12 = vadd.f32 %v269_v11, %v268_v10 }
  0xca   : > { %v271_v13 = vrot.slane %v270_v12, 1 }
  0xcc   : > { %v272_v15 = vadd.f32 %v271_v13, %v270_v12 }
  0xce   : > { %v273_v16 = vadd.f32 %v272_v15, %v266_v14 }
  0xd0   : > { %274 = vst [vmem:[%s236_s6] sm:$0x1] %v273_v16 }
  0xd1   : > { %515 = shalt.err (!%p512_p4)
}
  0xd2   : > { %s516_s5 = scalar_lea.hbm %s741_s7, 128  ;;  %s520_s19 = scalar_lea.hbm %s793_s3, 256 }
  0xd3   : > { %p517_p10 = scmp.ne.s32.totalorder %s741_s7, %s516_s5  ;;  %p521_p2 = scmp.lt.u32.totalorder %s741_s7, %s793_s3 }
  0xd4   : > { %p522_p5 = scmp.lt.u32.totalorder %s520_s19, %s516_s5  ;;  %p524_p8 = scmp.lt.u32.totalorder %s516_s5, %s741_s7 }
  0xd5   : > { %p518_p12 = pnand %p517_p10, %p802_p11 }
  0xd6   : > { %p523_p9 = por %p522_p5, %p521_p2 }
  0xd7   : > { %p519_p1 = pneg %p518_p12 }
  0xd8   : > { %p525_p0 = por %p524_p8, %p523_p9 }
  0xda   : > { %p526_p7 = pnand %p525_p0, %p519_p1 }
  0xdc   : > { %529 = shalt.err (!%p526_p7)
}
  0xdd   : > { %409 = dma.vmem_to_hbm [thread:$0]  (%p802_p11), %s743_s29, 128, %s741_s7, %s276_s11  }
  0xde PF: > { %s301_s24 = sand.u32 1, %s564_s12   ;;  %p803_p13 = scmp.ne.s32.totalorder %s798_s27, 0 }
  0xdf   : > { %p804_p3 = scmp.ge.s32.totalorder %s584_s17, 2  ;;  %s302_s23 = scalar_lea.sflag [#allocation4], %s301_s24 }
  0xe1   : > { %p416_p6 = pnand %p804_p3, %p803_p13 }
  0xe3   : > { %559 = dma.done.wait (!%p416_p6), %s302_s23, 128  }
  0xe4   : > { %561 = vsyncadd (!%p416_p6), %s302_s23, 4294967168  ;;  %s19_s17 = sadd.s32 1, %s584_s17   ;;  %s805_s12 = smov %s568_s13 }
  0xe5   : > { %p16_p4 = scmp.ge.s32.totalorder %s19_s17, 4   ;;  %s806_s13 = smov %s572_s14 }
  0xe6   : > { %s807_s14 = smov %s666_s26  ;;  %s808_s15 = smov %s580_s16 }
  0xe7   : > { %s809_s16 = smov %s811_s20  ;;  %18 = sbr.rel (!%p16_p4) target bundleno = 6 (0x6), region = 87 }
  0xee   :  { %307 = vsyncpa [#allocation3], 1 }
  0xef   :  { %309 = vsyncpa [#allocation3 + $0x1], 1 }
  0xf0   :  { %310 = vsyncpa [#allocation4], 1 }
  0xf1   :  { %312 = vsyncpa [#allocation4 + $0x1], 1 }

</bundles_post_ra>
